<compile_context>
chip_gen: v7x
topology: tpu7x:2x2x1
jax: 0.10.0
libtpu: 0.0.40
codegen_flags: <defaults>
</compile_context>

<pallas_src>
import functools

import jax
import jax.numpy as jnp
from jax.experimental import pallas as pl
from jax.experimental.pallas import tpu as pltpu


def _round_up(x, m):
    return ((x + m - 1) // m) * m


# ---------------------------------------------------------------------------
# Hardware-aware defaults
# ---------------------------------------------------------------------------
def _vmem_capacity_bytes():
    try:
        info = pltpu.get_tpu_info()
        cap = getattr(info, "vmem_capacity_bytes", None)
        if cap:
            return int(cap)
    except Exception:
        pass
    try:
        kind = jax.devices()[0].device_kind.lower()
        if "7" in kind:  # v7x-class part
            return 64 << 20
    except Exception:
        pass
    return 128 << 20


def _hw_config():
    cap = _vmem_capacity_bytes()
    if cap <= (64 << 20):
        # v7x: 64 MiB VMEM per TC -> leave headroom, pay for bigger tile_m by
        # shrinking tile_h.
        return {"tile_m": 512, "tile_h": 256, "vmem_limit_bytes": 48 << 20}
    # v5e / v6e: 128 MiB VMEM.  tile_m ~1024 puts v6e past its ~650 FLOP/byte
    # roofline knee; v5e is already MXU-bound and benefits from fewer hidden
    # grid steps (bigger tile_h).
    return {"tile_m": 1024, "tile_h": 512, "vmem_limit_bytes": 100 << 20}


def _pick_tile_h(hidden, tile_h):
    """Largest multiple of 128 <= tile_h that divides round_up(hidden,128)."""
    h128 = _round_up(hidden, 128)
    th = min(tile_h, h128)
    t = (th // 128) * 128
    while t >= 128:
        if h128 % t == 0:
            return t
        t -= 128
    return 128


def _shrink_to_fit(tm, th, dim_p, out_itemsize, use_acc, budget):
    """Halve tile_m until the estimated VMEM footprint fits the budget."""
    def need(tm_):
        w = 2 * 2 * (dim_p * 2 * th + th * dim_p)      # bf16 weights, 2-buffered
        x = 2 * 2 * tm_ * dim_p                        # bf16 x, 2-buffered
        o = 2 * tm_ * dim_p * out_itemsize             # output block
        acc = tm_ * dim_p * 4 if use_acc else 0        # f32 accumulator scratch
        tmp = tm_ * 2 * th * (4 + 2)                   # f32 h13 + bf16 gate
        return w + x + o + acc + tmp

    while tm > 16 and need(tm) > budget:
        tm = max(16, _round_up(tm // 2, 16))
    return tm


# ---------------------------------------------------------------------------
# Kernels
# ---------------------------------------------------------------------------
def _bilinear_kernel_accout(x_ref, w13_ref, w2_ref, o_ref):
    # f32 output: the resident output block IS the accumulator (no scratch).
    # x_ref:   (TM, dim_p)      bf16
    # w13_ref: (dim_p, 2*TH)    bf16   [w1 tile | w3 tile]
    # w2_ref:  (TH, dim_p)      bf16
    # o_ref:   (TM, dim_p)      f32
    j = pl.program_id(1)
    th = w2_ref.shape[0]

    @pl.when(j == 0)
    def _init():
        o_ref[...] = jnp.zeros_like(o_ref)

    x = x_ref[...]
    h13 = jnp.dot(x, w13_ref[...], preferred_element_type=jnp.float32)
    h = (h13[:, :th] * h13[:, th:]).astype(jnp.bfloat16)  # gate in f32, cast for MXU
    o_ref[...] += jnp.dot(h, w2_ref[...], preferred_element_type=jnp.float32)


def _bilinear_kernel_scratch(x_ref, w13_ref, w2_ref, o_ref, acc_ref):
    # Non-f32 output: accumulate in a f32 VMEM scratch, cast at the end.
    j = pl.program_id(1)
    th = w2_ref.shape[0]

    @pl.when(j == 0)
    def _init():
        acc_ref[...] = jnp.zeros_like(acc_ref)

    x = x_ref[...]
    h13 = jnp.dot(x, w13_ref[...], preferred_element_type=jnp.float32)
    h = (h13[:, :th] * h13[:, th:]).astype(jnp.bfloat16)
    acc_ref[...] += jnp.dot(h, w2_ref[...], preferred_element_type=jnp.float32)

    @pl.when(j == pl.num_programs(1) - 1)
    def _finalize():
        o_ref[...] = acc_ref[...].astype(o_ref.dtype)


# ---------------------------------------------------------------------------
# One-time weight preparation (hoisted out of the per-call path)
# ---------------------------------------------------------------------------
def prepare_bilinear_weights(w1_t, w3_t, w2_t, *, tile_h, compute_dtype=jnp.bfloat16):
    """Pad/cast weights once and interleave w1/w3 per hidden tile.

    w1_t/w3_t: (dim, hidden); w2_t: (hidden, dim).
    Returns (w13_p, w2_p, th) where w13_p is (dim_p, 2*hidden_p) with hidden
    tile j stored as columns [j*2*th, (j+1)*2*th) = [w1 tile j | w3 tile j].
    """
    dim, hidden = w1_t.shape
    dim_p = _round_up(dim, 128)
    th = _pick_tile_h(hidden, tile_h)
    hidden_p = _round_up(hidden, th)
    n_h = hidden_p // th
    cdt = compute_dtype

    w1_p = jnp.zeros((dim_p, hidden_p), cdt).at[:dim, :hidden].set(w1_t.astype(cdt))
    w3_p = jnp.zeros((dim_p, hidden_p), cdt).at[:dim, :hidden].set(w3_t.astype(cdt))
    w13_p = jnp.concatenate(
        [w1_p.reshape(dim_p, n_h, th), w3_p.reshape(dim_p, n_h, th)], axis=2
    ).reshape(dim_p, 2 * hidden_p)
    w2_p = jnp.zeros((hidden_p, dim_p), cdt).at[:hidden, :dim].set(w2_t.astype(cdt))
    return w13_p, w2_p, th


# ---------------------------------------------------------------------------
# Forward
# ---------------------------------------------------------------------------
@functools.partial(jax.jit, static_argnames=("tile_m", "tile_h", "vmem_limit_bytes"))
def bilinear_forward(x, w13_p, w2_p, *, tile_m, tile_h, vmem_limit_bytes):
    """x: (..., dim); w13_p/w2_p from prepare_bilinear_weights(tile_h=tile_h)."""
    orig_shape = x.shape
    orig_dtype = x.dtype
    dim = orig_shape[-1]
    hidden_p, dim_p = w2_p.shape
    th = tile_h
    assert hidden_p % th == 0
    assert w13_p.shape == (dim_p, 2 * hidden_p)
    assert dim <= dim_p

    x2d = x.reshape(-1, dim)
    n = x2d.shape[0]
    out_itemsize = jnp.dtype(orig_dtype).itemsize
    use_acc = orig_dtype != jnp.float32

    # Row tile: multiple of 16 (bf16 sublane pair), clamped to the row count,
    # shrunk if the VMEM budget would be exceeded.
    tm = min(tile_m, _round_up(n, 16))
    tm = max(16, (tm // 16) * 16)
    tm = _shrink_to_fit(tm, th, dim_p, out_itemsize, use_acc,
                        int(vmem_limit_bytes * 0.9))
    n_p = _round_up(n, tm)

    cdt = jnp.bfloat16
    if dim == dim_p and n == n_p:
        x_p = x2d.astype(cdt)          # no pad needed (static check)
    else:
        x_p = jnp.zeros((n_p, dim_p), cdt).at[:n, :dim].set(x2d.astype(cdt))

    grid = (n_p // tm, hidden_p // th)
    row_tiles = grid[0]

    if use_acc:
        kernel = _bilinear_kernel_scratch
        scratch_shapes = [pltpu.VMEM((tm, dim_p), jnp.float32)]
    else:
        kernel = _bilinear_kernel_accout
        scratch_shapes = []

    flops = 6 * n_p * dim_p * hidden_p                   # 3 matmuls, 2*M*K*N each
    w_bytes = 2 * (w13_p.size + w2_p.size)               # bf16
    bytes_accessed = (
        2 * x_p.size                                     # bf16 input
        + row_tiles * w_bytes                            # weights re-streamed per row tile
        + n_p * dim_p * out_itemsize                     # output
    )

    out = pl.pallas_call(
        kernel,
        out_shape=jax.ShapeDtypeStruct((n_p, dim_p), orig_dtype),
        grid_spec=pltpu.PrefetchScalarGridSpec(
            num_scalar_prefetch=0,
            grid=grid,
            in_specs=[
                pl.BlockSpec((tm, dim_p), lambda i, j: (i, 0)),
                pl.BlockSpec((dim_p, 2 * th), lambda i, j: (0, j)),
                pl.BlockSpec((th, dim_p), lambda i, j: (j, 0)),
            ],
            out_specs=pl.BlockSpec((tm, dim_p), lambda i, j: (i, 0)),
            scratch_shapes=scratch_shapes,
        ),
        compiler_params=pltpu.CompilerParams(
            dimension_semantics=("parallel", "arbitrary"),
            vmem_limit_bytes=vmem_limit_bytes,
        ),
        cost_estimate=pl.CostEstimate(
            flops=flops, transcendentals=0, bytes_accessed=bytes_accessed),
    )(x_p, w13_p, w2_p)

    return out[:n, :dim].reshape(orig_shape)


# ---------------------------------------------------------------------------
# Synthetic parameters matching BiLinear.__init__
# ---------------------------------------------------------------------------
def make_params(dim, multiple_of=4, key=jax.random.PRNGKey(0)):
    hidden_dim = 4 * dim
    hidden_dim = int(2 * hidden_dim / 3)
    hidden_dim = multiple_of * ((hidden_dim + multiple_of - 1) // multiple_of)

    k1, k2, k3 = jax.random.split(key, 3)
    # nn.Linear(dim, hidden) weight is (hidden, dim); store the transpose
    # (dim, hidden) so the kernel does y = x @ W_t directly.
    bound1 = 1.0 / (dim ** 0.5)
    bound2 = 1.0 / (hidden_dim ** 0.5)
    w1_t = jax.random.uniform(k1, (dim, hidden_dim), jnp.float32, -bound1, bound1)
    w3_t = jax.random.uniform(k3, (dim, hidden_dim), jnp.float32, -bound1, bound1)
    w2_t = jax.random.uniform(k2, (hidden_dim, dim), jnp.float32, -bound2, bound2)
    return w1_t, w3_t, w2_t, hidden_dim


if __name__ == "__main__":
    # TODO(synk): dropout (module default dropout=None) is the identity here;
    # bias=False so no bias terms.
    dim = 256
    batch, seq = 2, 8

    # multiple_of=128 gives a lane-aligned hidden_dim (682 -> 768); misaligned
    # configs are handled by zero padding in prepare_bilinear_weights anyway.
    w1_t, w3_t, w2_t, hidden_dim = make_params(dim, multiple_of=128)

    cfg = _hw_config()
    # Weight prep is one-time (hoisted out of the per-call path).
    w13_p, w2_p, th = prepare_bilinear_weights(w1_t, w3_t, w2_t,
                                               tile_h=cfg["tile_h"])

    key = jax.random.PRNGKey(0)
    x = jax.random.normal(key, (batch, seq, dim), dtype=jnp.float32)

    y = bilinear_forward(x, w13_p, w2_p,
                         tile_m=cfg["tile_m"], tile_h=th,
                         vmem_limit_bytes=cfg["vmem_limit_bytes"])
    y = jax.block_until_ready(y)
    assert y.shape == x.shape

    # Reference using the same bf16 compute / f32 accumulation as the kernel.
    xb = x.reshape(-1, dim).astype(jnp.bfloat16)
    h1 = jnp.dot(xb, w1_t.astype(jnp.bfloat16), preferred_element_type=jnp.float32)
    h3 = jnp.dot(xb, w3_t.astype(jnp.bfloat16), preferred_element_type=jnp.float32)
    h = (h1 * h3).astype(jnp.bfloat16)
    ref = jnp.dot(h, w2_t.astype(jnp.bfloat16),
                  preferred_element_type=jnp.float32).reshape(x.shape)
    assert jnp.allclose(y, ref, atol=5e-3, rtol=5e-3), "mismatch vs bf16 reference"

    # Loose sanity check against full-f32 math (bf16 MXU compute, so loose tol).
    ref_f32 = ((x @ w1_t) * (x @ w3_t)) @ w2_t
    assert jnp.allclose(y, ref_f32, atol=5e-2, rtol=5e-2), "mismatch vs f32 reference"

    print("KERNEL_OK")
</pallas_src>

<mosaic_0001>
module attributes {stable_mosaic.version = 11 : i64} {
  func.func @_bilinear_kernel_accout(%arg0: i32, %arg1: i32, %arg2: memref<16x256xbf16, #tpu.memory_space<vmem>>, %arg3: memref<256x768xbf16, #tpu.memory_space<vmem>>, %arg4: memref<384x256xbf16, #tpu.memory_space<vmem>>, %arg5: memref<16x256xf32, #tpu.memory_space<vmem>>) attributes {dimension_semantics = [#tpu.dimension_semantics<parallel>, #tpu.dimension_semantics<arbitrary>], iteration_bounds = array<i64: 1, 2>, scalar_prefetch = 0 : i64, scratch_operands = 0 : i64, tpu.core_type = #tpu.core_type<tc>, window_params = [{transform_indices = @transform_0, window_bounds = array<i64: 16, 256>}, {transform_indices = @transform_1, window_bounds = array<i64: 256, 768>}, {transform_indices = @transform_2, window_bounds = array<i64: 384, 256>}, {transform_indices = @transform_3, window_bounds = array<i64: 16, 256>}]} {
    %c0_i32 = arith.constant 0 : i32
    %0 = arith.cmpi eq, %arg1, %c0_i32 : i32
    %1 = arith.extui %0 : i1 to i32
    %c0_i32_0 = arith.constant 0 : i32
    %2 = arith.cmpi ne, %1, %c0_i32_0 : i32
    scf.if %2 {
      %cst_11 = arith.constant 0.000000e+00 : f32
      %15 = vector.broadcast %cst_11 : f32 to vector<16x256xf32>
      %c0_12 = arith.constant 0 : index
      %c0_13 = arith.constant 0 : index
      %16 = vector.load %arg5[%c0_12, %c0_13] : memref<16x256xf32, #tpu.memory_space<vmem>>, vector<16x256xf32>
      tpu.vector_store %arg5[%c0_12, %c0_13], %15 {strides = array<i32>} : memref<16x256xf32, #tpu.memory_space<vmem>>, vector<16x256xf32>,
    } else {
    }
    %c0 = arith.constant 0 : index
    %c0_1 = arith.constant 0 : index
    %3 = vector.load %arg2[%c0, %c0_1] : memref<16x256xbf16, #tpu.memory_space<vmem>>, vector<16x256xbf16>
    %c0_2 = arith.constant 0 : index
    %c0_3 = arith.constant 0 : index
    %4 = vector.load %arg3[%c0_2, %c0_3] : memref<256x768xbf16, #tpu.memory_space<vmem>>, vector<256x768xbf16>
    %cst = arith.constant dense<0.000000e+00> : vector<16x768xf32>
    %5 = tpu.matmul %3, %4, %cst {dimension_numbers = #tpu.dot_dimension_numbers<[1], [0], [0], [1], [0, 0, 1, 1], [], []>} : vector<16x256xbf16>, vector<256x768xbf16>, vector<16x768xf32> -> vector<16x768xf32>
    %6 = vector.extract_strided_slice %5 {offsets = [0, 0], sizes = [16, 384], strides = [1, 1]} : vector<16x768xf32> to vector<16x384xf32>
    %7 = vector.extract_strided_slice %5 {offsets = [0, 384], sizes = [16, 384], strides = [1, 1]} : vector<16x768xf32> to vector<16x384xf32>
    %8 = arith.mulf %6, %7 : vector<16x384xf32>
    %9 = arith.truncf %8 : vector<16x384xf32> to vector<16x384xbf16>
    %c0_4 = arith.constant 0 : index
    %c0_5 = arith.constant 0 : index
    %10 = vector.load %arg5[%c0_4, %c0_5] : memref<16x256xf32, #tpu.memory_space<vmem>>, vector<16x256xf32>
    %c0_6 = arith.constant 0 : index
    %c0_7 = arith.constant 0 : index
    %11 = vector.load %arg4[%c0_6, %c0_7] : memref<384x256xbf16, #tpu.memory_space<vmem>>, vector<384x256xbf16>
    %cst_8 = arith.constant dense<0.000000e+00> : vector<16x256xf32>
    %12 = tpu.matmul %9, %11, %cst_8 {dimension_numbers = #tpu.dot_dimension_numbers<[1], [0], [0], [1], [0, 0, 1, 1], [], []>} : vector<16x384xbf16>, vector<384x256xbf16>, vector<16x256xf32> -> vector<16x256xf32>
    %13 = arith.addf %10, %12 : vector<16x256xf32>
    %c0_9 = arith.constant 0 : index
    %c0_10 = arith.constant 0 : index
    %14 = vector.load %arg5[%c0_9, %c0_10] : memref<16x256xf32, #tpu.memory_space<vmem>>, vector<16x256xf32>
    tpu.vector_store %arg5[%c0_9, %c0_10], %13 {strides = array<i32>} : memref<16x256xf32, #tpu.memory_space<vmem>>, vector<16x256xf32>,
    return
  }
  func.func @transform_0(%arg0: i32, %arg1: i32) -> (i32, i32) {
    %c0_i32 = arith.constant 0 : i32
    %c0_i32_0 = arith.constant 0 : i32
    return %arg0, %c0_i32 : i32, i32
  }
  func.func @transform_1(%arg0: i32, %arg1: i32) -> (i32, i32) {
    %c0_i32 = arith.constant 0 : i32
    %c0_i32_0 = arith.constant 0 : i32
    return %c0_i32, %arg1 : i32, i32
  }
  func.func @transform_2(%arg0: i32, %arg1: i32) -> (i32, i32) {
    %c0_i32 = arith.constant 0 : i32
    %c0_i32_0 = arith.constant 0 : i32
    return %arg1, %c0_i32 : i32, i32
  }
  func.func @transform_3(%arg0: i32, %arg1: i32) -> (i32, i32) {
    %c0_i32 = arith.constant 0 : i32
    %c0_i32_0 = arith.constant 0 : i32
    return %arg0, %c0_i32 : i32, i32
  }
}

</mosaic_0001>

<bundles_post_ra>
// kernel: bilinear_forward.1
= control target key start
LH: loop header
LB: loop body
LE: loop exit
PB: predicated region body
PF: predicated region fallthrough
CT: control target
= control target key end

     0   :  { %8 = vsyncpa [#allocation3], 0  ;;  %s2550_s0 = inlined_call_operand.hbm [shape: bf16[16,256], index: 0, kind: input, shape index: {}]   ;;  %s2551_s1 = inlined_call_operand.hbm [shape: bf16[256,1536], index: 1, kind: input, shape index: {}]   ;;  %s2552_s2 = inlined_call_operand.hbm [shape: bf16[768,256], index: 2, kind: input, shape index: {}]   ;;  %s2553_s3 = inlined_call_operand.hbm [shape: f32[16,256], index: 3, kind: output, shape index: {}]  }
   0x1   :  { %9 = vsyncpa [#allocation6], 0 }
   0x2   :  { %11 = vsyncpa [#allocation6 + $0x1], 0 }
   0x3   :  { %12 = vsyncpa [#allocation4], 0  ;;  %s2174_s12 = smov 0   ;;  %s2176_s13 = smov 0  }
   0x4   :  { %s2178_s14 = smov 0   ;;  %s2180_s15 = smov 0  }
   0x5   :  { %s2182_s16 = smov 0   ;;  %s2184_s17 = smov 0  }
   0x6 LB: > { %s27_s18 = sadd.s32 1, %s2135_s16  ;;  %s63_s19 = sadd.s32 1, %s2127_s14  ;;  %s2139_s17 = sphi %s2184_s17, %s18_s17   ;;  %s2135_s16 = sphi %s2182_s16, %s2575_s16   ;;  %s2131_s15 = sphi %s2180_s15, %s2574_s15   ;;  %s2127_s14 = sphi %s2178_s14, %s2573_s14   ;;  %s2123_s13 = sphi %s2176_s13, %s2572_s13   ;;  %s2119_s12 = sphi %s2174_s12, %s2571_s12  }
   0x7   : > { %p28_p0 = scmp.ge.s32.totalorder %s27_s18, 2  ;;  %p70_p1 = scmp.ne.s32.totalorder %s2127_s14, %s2123_s13 }
   0x8   : > { %p71_p2 = scmp.eq.s32.totalorder %s2139_s17, 0  ;;  %p1685_p4 = scmp.lt.s32.totalorder %s2139_s17, 2 }
   0x9   : > { %s2577_s18 = smov (%p28_p0, %s27_s18), 0  ;;  %s169_s21 = sand.u32 1, %s2139_s17  }
   0xa   : > { %p72_p3 = por %p71_p2, %p70_p1  ;;  %s60_s20 = ssub.s32 %s2135_s16, %s2577_s18 }
   0xb   : > { %p61_p5 = scmp.eq.s32.totalorder %s60_s20, 0  ;;  %s171_s22 = sand.u32 1, %s2127_s14  }
   0xc   : > { %s1649_s23 = smul.u32 384, %s2135_s16  ;;  %p2227_p6 = pnand %p1685_p4, %p72_p3 }
   0xd   : > { %s2218_s24 = scalar_select %p61_p5, %s2127_s14, %s63_s19  }
   0xe   : > { %s1657_s25 = smul.u32 768, %s171_s22  ;;  %s2225_s28 = scalar_lea.hbm %s2551_s1, %s1649_s23 }
   0xf   : > { %s2560_s29 = scalar_select %p2227_p6, 1, 0 }
  0x10   : > { %s173_s30 = scalar_lea.vmem [#allocation5], %s1657_s25  ;;  %s2233_s5 = scalar_lea.sflag [#allocation6], %s169_s21 }
  0x11   : > { %s180_s4 = sshll.u32 %s173_s30, 4  ;;  %s1967_s6 = scalar_lea.hbm %s2225_s28, 12288  ;;  %s2231_s4 = int_to_ptr.vmem [resolvable:$true] %s180_s4 }
  0x12   : > { %p1968_p7 = scmp.ne.s32.totalorder %s2225_s28, %s1967_s6  ;;  %p2555_p8 = pneg %p2227_p6 }
  0x13   : > { %s1972_s9 = scalar_lea.hbm %s2551_s1, 24576  ;;  %p1973_p11 = scmp.lt.u32.totalorder %s2225_s28, %s2551_s1 }
  0x14   : > { %p1970_p9 = pnand %p2555_p8, %p1968_p7  ;;  %p1974_p12 = scmp.lt.u32.totalorder %s1972_s9, %s1967_s6 }
  0x15   : > { %p1976_p0 = scmp.lt.u32.totalorder %s1967_s6, %s2225_s28 }
  0x16   : > { %p1971_p10 = pneg %p1970_p9  ;;  %p1975_p13 = por %p1974_p12, %p1973_p11 }
  0x18   : > { %p1977_p1 = por %p1976_p0, %p1975_p13 }
  0x1a   : > { %p1978_p2 = pnand %p1977_p1, %p1971_p10 }
  0x1c   : > { %1981 = shalt.err (!%p1978_p2)
}
  0x1d   : > { %s1982_s19 = scalar_lea.vmem %s2231_s4, 12288  ;;  %s2141_s20 = smov [#allocation5]  }
  0x1e   : > { %p1983_p3 = scmp.ne.s32.totalorder %s2231_s4, %s1982_s19  ;;  %s1987_s21 = sshll.u32 %s2141_s20, 4  ;;  %s1988_s21 = int_to_ptr.vmem [resolvable:$false] %s1987_s21 }
  0x1f   : > { %s1989_s23 = scalar_lea.vmem %s1988_s21, 24576  ;;  %p1990_p7 = scmp.lt.s32.totalorder %s2231_s4, %s1988_s21 }
  0x20   : > { %p1985_p4 = pnand %p1983_p3, %p2555_p8  ;;  %p1991_p9 = scmp.lt.s32.totalorder %s1989_s23, %s1982_s19 }
  0x22   : > { %p1986_p5 = pneg %p1985_p4  ;;  %p1992_p11 = por %p1991_p9, %p1990_p7 }
  0x24   : > { %p1993_p12 = pnand %p1992_p11, %p1986_p5 }
  0x26   : > { %1996 = shalt.err (!%p1993_p12)
}
  0x27   : > { %s2142_s25 = smov 768   ;;  %s2143_s26 = smov 384  }
  0x28   : > { %s2144_s27 = smov 24   ;;  %s2262_s30 = sadd.s32 4294967295, %s2139_s17  }
  0x29   : > { %1680 = dma.hbm_to_vmem [thread:$0]  (!%p2227_p6), %s2225_s28, 12288, %s2231_s4, %s2233_s5, %s2142_s25, %s2143_s26, %s2144_s27  }
  0x2a   : > { %p76_p10 = scmp.ne.s32.totalorder %s2123_s13, %s2119_s12  ;;  %p2554_p13 = scmp.eq.s32.totalorder %s2262_s30, 0 }
  0x2b   : > { %p1490_p0 = scmp.ge.s32.totalorder %s2139_s17, 1  ;;  %p139_p1 = scmp.lt.s32.totalorder %s2139_s17, 3 }
  0x2c   : > { %p2271_p2 = por %p2554_p13, %p76_p10  ;;  %s2145_s28 = smov [#allocation2]  }
  0x2d   : > { %p2275_p3 = pnand %p1490_p0, %p139_p1  ;;  %s155_s4 = sshll.u32 %s2145_s28, 4  ;;  %s156_s4 = int_to_ptr.vmem [resolvable:$true] %s155_s4 }
  0x2e   : > { %s2561_s6 = scalar_select %p2271_p2, 1, 0 }
  0x2f   : > { %s2562_s7 = scalar_select %p2275_p3, 1, 0 }
  0x30   : > { %p1673_p4 = pneg %p2275_p3  ;;  %s1658_s12 = smul.u32 384, %s171_s22 }
  0x31   : > { %s1652_s9 = smul.u32 6144, %s2135_s16  ;;  %s1997_s23 = scalar_lea.hbm %s2550_s0, 256 }
  0x32   : > { %p2285_p5 = pnand %p1673_p4, %p2554_p13  ;;  %p1998_p7 = scmp.ne.s32.totalorder %s2550_s0, %s1997_s23 }
  0x33   : > { %s2293_s19 = scalar_lea.hbm %s2552_s2, %s1652_s9  ;;  %p2004_p10 = scmp.lt.u32.totalorder %s1997_s23, %s2550_s0 }
  0x34   : > { %p1999_p9 = pneg %p2285_p5 }
  0x36   : > { %p2000_p11 = pnand %p1999_p9, %p1998_p7 }
  0x38   : > { %p2001_p12 = pneg %p2000_p11 }
  0x3a   : > { %p2006_p0 = pnand %p2004_p10, %p2001_p12 }
  0x3c   : > { %2009 = shalt.err (!%p2006_p0)
}
  0x3d   : > { %s2010_s28 = scalar_lea.vmem %s156_s4, 256  ;;  %p2018_p8 = scmp.lt.s32.totalorder %s156_s4, %s156_s4 }
  0x3e   : > { %p2011_p1 = scmp.ne.s32.totalorder %s156_s4, %s2010_s28  ;;  %p2019_p2 = scmp.lt.s32.totalorder %s2010_s28, %s2010_s28 }
  0x40   : > { %p2013_p4 = pnand %p2011_p1, %p1999_p9  ;;  %p2020_p3 = por %p2019_p2, %p2018_p8 }
  0x42   : > { %p2014_p13 = pneg %p2013_p4 }
  0x44   : > { %p2021_p6 = pnand %p2020_p3, %p2014_p13 }
  0x46   : > { %2024 = shalt.err (!%p2021_p6)
}
  0x47   : > { %s2146_s9 = smov 128   ;;  %s2147_s10 = smov 8  }
  0x48   : > { %1676 = dma.hbm_to_vmem [thread:$0]  (!%p2285_p5), %s2550_s0, 256, %s156_s4, [#allocation3], %s2146_s9, %s2146_s9, %s2147_s10  }
  0x49   : > { %s194_s21 = scalar_lea.vmem [#allocation7], %s1658_s12  ;;  %s2025_s25 = scalar_lea.hbm %s2293_s19, 6144 }
  0x4a   : > { %s202_s23 = sshll.u32 %s194_s21, 4  ;;  %p2026_p6 = scmp.ne.s32.totalorder %s2293_s19, %s2025_s25  ;;  %s2314_s23 = int_to_ptr.vmem [resolvable:$true] %s202_s23 }
  0x4b   : > { %p2564_p8 = scmp.ne.s32.totalorder %s2560_s29, 0  ;;  %s2030_s8 = scalar_lea.hbm %s2552_s2, 12288 }
  0x4c   : > { %p2031_p7 = scmp.lt.u32.totalorder %s2293_s19, %s2552_s2  ;;  %p2032_p9 = scmp.lt.u32.totalorder %s2030_s8, %s2025_s25 }
  0x4d   : > { %p2565_p13 = pneg %p2564_p8  ;;  %p2034_p11 = scmp.lt.u32.totalorder %s2025_s25, %s2293_s19 }
  0x4e   : > { %p2033_p5 = por %p2032_p9, %p2031_p7 }
  0x4f   : > { %p2028_p2 = pnand %p2026_p6, %p2565_p13 }
  0x50   : > { %p2035_p12 = por %p2034_p11, %p2033_p5 }
  0x51   : > { %p2029_p3 = pneg %p2028_p2 }
  0x53   : > { %p2036_p10 = pnand %p2035_p12, %p2029_p3 }
  0x55   : > { %2039 = shalt.err (!%p2036_p10)
}
  0x56   : > { %s2040_s4 = scalar_lea.vmem %s2314_s23, 6144  ;;  %p2566_p1 = pmov %p2565_p13 }
  0x57   : > { %p2041_p0 = scmp.ne.s32.totalorder %s2314_s23, %s2040_s4  ;;  %s2148_s12 = smov [#allocation7]  }
  0x58   : > { %s2045_s11 = sshll.u32 %s2148_s12, 4  ;;  %s2046_s11 = int_to_ptr.vmem [resolvable:$false] %s2045_s11 }
  0x59   : > { %p2043_p4 = pnand %p2041_p0, %p2566_p1  ;;  %s2047_s20 = scalar_lea.vmem %s2046_s11, 12288 }
  0x5a   : > { %p2048_p13 = scmp.lt.s32.totalorder %s2314_s23, %s2046_s11  ;;  %p2049_p2 = scmp.lt.s32.totalorder %s2047_s20, %s2040_s4 }
  0x5b   : > { %p2044_p6 = pneg %p2043_p4 }
  0x5c   : > { %p2050_p7 = por %p2049_p2, %p2048_p13 }
  0x5e   : > { %p2051_p9 = pnand %p2050_p7, %p2044_p6 }
  0x60   : > { %2054 = shalt.err (!%p2051_p9)
}
  0x61   : > { %1683 = dma.hbm_to_vmem [thread:$0]  (!%p2564_p8), %s2293_s19, 6144, %s2314_s23, %s2233_s5, %s2146_s9, %s2146_s9, %s2147_s10  }
  0x62   : > { %p2567_p3 = scmp.ne.s32.totalorder %s2562_s7, 0 }
  0x63   : > { %p2568_p5 = scmp.eq.s32.totalorder (!%p2567_p3), %s2262_s30, 0 }
  0x64   : > { %214 = sbr.rel (%p2567_p3) target bundleno = 735 (0x2df), region = 32 }
  0x6b   : > { %2106 = dma.done.wait (%p2568_p5), [#allocation3], 256   ;;  %p2569_p11 = pmov %p2568_p5 }
  0x6c   : > { %s220_s29 = sand.u32 1, %s2262_s30   ;;  %s222_s21 = sand.u32 1, %s2123_s13  }
  0x6d   : > { %2108 = vsyncadd (%p2569_p11), [#allocation3], 4294967040  ;;  %s1659_s25 = smul.u32 768, %s222_s21  ;;  %s221_s26 = scalar_lea.sflag [#allocation6], %s220_s29 }
  0x6e   : > { %p2570_p12 = scmp.ne.s32.totalorder %s2561_s6, 0 }
  0x6f   : > { %s2351_s22 = scalar_lea.vmem [#allocation5], %s1659_s25 }
  0x70   : > { %2110 = dma.done.wait (%p2570_p12), %s221_s26, 18432  }
  0x71   : > { %2112 = vsyncadd (%p2570_p12), %s221_s26, 4294948864  ;;  %s1660_s5 = smul.u32 384, %s222_s21  ;;  %p1498_p8 = scmp.ne.s32.totalorder %s2131_s15, 0 }
  0x72   : > { %v2149_v0 = vmov (!%p1498_p8), 0.0  }
  0x73   : > { %s2357_s7 = scalar_lea.vmem [#allocation7], %s1660_s5  ;;  %264 = sbr.rel (%p1498_p8) target bundleno = 122 (0x7a), region = 48  ;;  %265 = vst [vmem:[#allocation8] sm:$0xff] (!%p1498_p8), %v2149_v0  ;;  %266 = vst [vmem:[#allocation8 + $0x8] sm:$0xff] (!%p1498_p8), %v2149_v0 }
  0x74   : > { %267 = vst [vmem:[#allocation8 + $0x10] sm:$0xff] (!%p1498_p8), %v2149_v0  ;;  %268 = vst [vmem:[#allocation8 + $0x18] sm:$0xff] (!%p1498_p8), %v2149_v0 }
  0x7a PF: > { %v1748_v1 = vld [vmem:[%s2351_s22 + $0x4] ss:$24 sps:$4 sm:$0xff]   ;;  %v1752_v3 = vld [vmem:[%s2351_s22] ss:$24 sps:$4 sm:$0xff]   ;;  %v1754_v5 = vld [vmem:[%s2351_s22 + $0x34] ss:$24 sps:$4 sm:$0xff]  }
  0x7b   : > { %v1750_v2 = vld [vmem:[%s2351_s22 + $0xc] ss:$24 sps:$4 sm:$0xff]   ;;  %857 = vmatprep.subr.bf16.mxu0 %v1748_v1  ;;  %v1753_v4 = vld [vmem:[%s2351_s22 + $0x8] ss:$24 sps:$4 sm:$0xff]   ;;  %v1756_v6 = vld [vmem:[%s2351_s22 + $0x3c] ss:$24 sps:$4 sm:$0xff]  }
  0x7c   : > { %900 = vmatprep.subr.bf16.mxu1 %v1750_v2  ;;  %858 = vmatpush1.bf16.msra.mxu0 %v1752_v3  ;;  %v1758_v7 = vld [vmem:[%s2351_s22 + $0x30] ss:$24 sps:$4 sm:$0xff]   ;;  %v1760_v9 = vld [vmem:[%s2351_s22 + $0x64] ss:$24 sps:$4 sm:$0xff]   ;;  %v1764_v11 = vld [vmem:[%s2351_s22 + $0x60] ss:$24 sps:$4 sm:$0xff]  }
  0x7d   : > { %901 = vmatpush1.bf16.msra.mxu1 %v1753_v4  ;;  %859 = vmatprep.subr.bf16.mxu0 %v1754_v5  ;;  %v1759_v8 = vld [vmem:[%s2351_s22 + $0x38] ss:$24 sps:$4 sm:$0xff]   ;;  %v1762_v10 = vld [vmem:[%s2351_s22 + $0x6c] ss:$24 sps:$4 sm:$0xff]   ;;  %v1765_v12 = vld [vmem:[%s2351_s22 + $0x68] ss:$24 sps:$4 sm:$0xff]  }
  0x7e   : > { %902 = vmatprep.subr.bf16.mxu1 %v1756_v6  ;;  %v1766_v13 = vld [vmem:[%s2351_s22 + $0x94] ss:$24 sps:$4 sm:$0xff]   ;;  %v1770_v15 = vld [vmem:[%s2351_s22 + $0x90] ss:$24 sps:$4 sm:$0xff]   ;;  %v1772_v17 = vld [vmem:[%s2351_s22 + $0xc4] ss:$24 sps:$4 sm:$0xff]  }
  0x7f   : > { %v1768_v14 = vld [vmem:[%s2351_s22 + $0x9c] ss:$24 sps:$4 sm:$0xff]   ;;  %v1771_v16 = vld [vmem:[%s2351_s22 + $0x98] ss:$24 sps:$4 sm:$0xff]   ;;  %v1774_v18 = vld [vmem:[%s2351_s22 + $0xcc] ss:$24 sps:$4 sm:$0xff]  }
  0x80   : > { %860 = vmatpush1.bf16.msra.mxu0 %v1758_v7  ;;  %v1776_v19 = vld [vmem:[%s2351_s22 + $0xc0] ss:$24 sps:$4 sm:$0xff]   ;;  %v1778_v21 = vld [vmem:[%s2351_s22 + $0xf4] ss:$24 sps:$4 sm:$0xff]   ;;  %v1782_v23 = vld [vmem:[%s2351_s22 + $0xf0] ss:$24 sps:$4 sm:$0xff]  }
  0x81   : > { %903 = vmatpush1.bf16.msra.mxu1 %v1759_v8  ;;  %861 = vmatprep.subr.bf16.mxu0 %v1760_v9  ;;  %v1777_v20 = vld [vmem:[%s2351_s22 + $0xc8] ss:$24 sps:$4 sm:$0xff]   ;;  %v1780_v22 = vld [vmem:[%s2351_s22 + $0xfc] ss:$24 sps:$4 sm:$0xff]   ;;  %v1783_v24 = vld [vmem:[%s2351_s22 + $0xf8] ss:$24 sps:$4 sm:$0xff]  }
  0x82   : > { %904 = vmatprep.subr.bf16.mxu1 %v1762_v10  ;;  %v1784_v25 = vld [vmem:[%s2351_s22 + $0x124] ss:$24 sps:$4 sm:$0xff]   ;;  %v1788_v27 = vld [vmem:[%s2351_s22 + $0x120] ss:$24 sps:$4 sm:$0xff]   ;;  %v1790_v29 = vld [vmem:[%s2351_s22 + $0x154] ss:$24 sps:$4 sm:$0xff]  }
  0x83   : > { %v1786_v26 = vld [vmem:[%s2351_s22 + $0x12c] ss:$24 sps:$4 sm:$0xff]   ;;  %v1789_v28 = vld [vmem:[%s2351_s22 + $0x128] ss:$24 sps:$4 sm:$0xff]   ;;  %v1792_v30 = vld [vmem:[%s2351_s22 + $0x15c] ss:$24 sps:$4 sm:$0xff]  }
  0x84   : > { %862 = vmatpush1.bf16.msra.mxu0 %v1764_v11  ;;  %v1794_v31 = vld [vmem:[%s2351_s22 + $0x150] ss:$24 sps:$4 sm:$0xff]   ;;  %v1796_v33 = vld [vmem:[%s2351_s22 + $0x184] ss:$24 sps:$4 sm:$0xff]   ;;  %v1800_v35 = vld [vmem:[%s2351_s22 + $0x180] ss:$24 sps:$4 sm:$0xff]  }
  0x85   : > { %905 = vmatpush1.bf16.msra.mxu1 %v1765_v12  ;;  %863 = vmatprep.subr.bf16.mxu0 %v1766_v13  ;;  %v1795_v32 = vld [vmem:[%s2351_s22 + $0x158] ss:$24 sps:$4 sm:$0xff]   ;;  %v1798_v34 = vld [vmem:[%s2351_s22 + $0x18c] ss:$24 sps:$4 sm:$0xff]   ;;  %v1801_v36 = vld [vmem:[%s2351_s22 + $0x188] ss:$24 sps:$4 sm:$0xff]  }
  0x86   : > { %906 = vmatprep.subr.bf16.mxu1 %v1768_v14  ;;  %v1802_v37 = vld [vmem:[%s2351_s22 + $0x1b4] ss:$24 sps:$4 sm:$0xff]   ;;  %v1806_v39 = vld [vmem:[%s2351_s22 + $0x1b0] ss:$24 sps:$4 sm:$0xff]   ;;  %v1808_v41 = vld [vmem:[%s2351_s22 + $0x1e4] ss:$24 sps:$4 sm:$0xff]  }
  0x87   : > { %v1804_v38 = vld [vmem:[%s2351_s22 + $0x1bc] ss:$24 sps:$4 sm:$0xff]   ;;  %v1807_v40 = vld [vmem:[%s2351_s22 + $0x1b8] ss:$24 sps:$4 sm:$0xff]   ;;  %v1810_v42 = vld [vmem:[%s2351_s22 + $0x1ec] ss:$24 sps:$4 sm:$0xff]  }
  0x88   : > { %864 = vmatpush1.bf16.msra.mxu0 %v1770_v15  ;;  %v1812_v43 = vld [vmem:[%s2351_s22 + $0x1e0] ss:$24 sps:$4 sm:$0xff]   ;;  %v1814_v45 = vld [vmem:[%s2351_s22 + $0x214] ss:$24 sps:$4 sm:$0xff]   ;;  %v1818_v47 = vld [vmem:[%s2351_s22 + $0x210] ss:$24 sps:$4 sm:$0xff]  }
  0x89   : > { %907 = vmatpush1.bf16.msra.mxu1 %v1771_v16  ;;  %865 = vmatprep.subr.bf16.mxu0 %v1772_v17  ;;  %v1813_v44 = vld [vmem:[%s2351_s22 + $0x1e8] ss:$24 sps:$4 sm:$0xff]   ;;  %v1816_v46 = vld [vmem:[%s2351_s22 + $0x21c] ss:$24 sps:$4 sm:$0xff]   ;;  %v1819_v48 = vld [vmem:[%s2351_s22 + $0x218] ss:$24 sps:$4 sm:$0xff]  }
  0x8a   : > { %908 = vmatprep.subr.bf16.mxu1 %v1774_v18  ;;  %v1844_v49 = vld [vmem:[#allocation2 + $0x4] ss:$8 sps:$4 sm:$0xff]   ;;  %v1822_v51 = vld [vmem:[%s2351_s22 + $0x24c] ss:$24 sps:$4 sm:$0xff]   ;;  %v1824_v52 = vld [vmem:[%s2351_s22 + $0x240] ss:$24 sps:$4 sm:$0xff]  }
  0x8b   : > { %v1820_v50 = vld [vmem:[%s2351_s22 + $0x244] ss:$24 sps:$4 sm:$0xff]   ;;  %889 = vmatprep.mubr.bf16.mxu0 %v1844_v49  ;;  %932 = vmatprep.mubr.bf16.mxu1 %v1844_v49  ;;  %v1825_v53 = vld [vmem:[%s2351_s22 + $0x248] ss:$24 sps:$4 sm:$0xff]   ;;  %v1826_v54 = vld [vmem:[%s2351_s22 + $0x274] ss:$24 sps:$4 sm:$0xff]  }
  0x8c   : > { %866 = vmatpush1.bf16.msra.mxu0 %v1776_v19  ;;  %v1828_v55 = vld [vmem:[%s2351_s22 + $0x27c] ss:$24 sps:$4 sm:$0xff]   ;;  %v1830_v56 = vld [vmem:[%s2351_s22 + $0x270] ss:$24 sps:$4 sm:$0xff]   ;;  %v1834_v59 = vld [vmem:[%s2351_s22 + $0x2ac] ss:$24 sps:$4 sm:$0xff]  }
  0x8d   : > { %909 = vmatpush1.bf16.msra.mxu1 %v1777_v20  ;;  %867 = vmatprep.subr.bf16.mxu0 %v1778_v21  ;;  %v1831_v57 = vld [vmem:[%s2351_s22 + $0x278] ss:$24 sps:$4 sm:$0xff]   ;;  %v1832_v58 = vld [vmem:[%s2351_s22 + $0x2a4] ss:$24 sps:$4 sm:$0xff]   ;;  %v1837_v61 = vld [vmem:[%s2351_s22 + $0x2a8] ss:$24 sps:$4 sm:$0xff]  }
  0x8e   : > { %910 = vmatprep.subr.bf16.mxu1 %v1780_v22  ;;  %v1836_v60 = vld [vmem:[%s2351_s22 + $0x2a0] ss:$24 sps:$4 sm:$0xff]   ;;  %v1838_v62 = vld [vmem:[%s2351_s22 + $0x2d4] ss:$24 sps:$4 sm:$0xff]   ;;  %v1842_v0 = vld [vmem:[%s2351_s22 + $0x2d0] ss:$24 sps:$4 sm:$0xff]  }
  0x8f   : > { %v1840_v63 = vld [vmem:[%s2351_s22 + $0x2dc] ss:$24 sps:$4 sm:$0xff]   ;;  %v1843_v1 = vld [vmem:[%s2351_s22 + $0x2d8] ss:$24 sps:$4 sm:$0xff]   ;;  %s2151_s15 = smov [#allocation8]   ;;  %p1687_p10 = scmp.eq.s32.totalorder %s2262_s30, 1 }
  0x90   : > { %868 = vmatpush1.bf16.msra.mxu0 %v1782_v23  ;;  %v1849_v2 = vld [vmem:[%s2351_s22 + $0x14] ss:$24 sps:$4 sm:$0xff]   ;;  %v2425_v3 = vld [vmem:[#allocation2] ss:$8 sps:$4 sm:$0xff]   ;;  %v1852_v5 = vld [vmem:[%s2351_s22 + $0x44] ss:$24 sps:$4 sm:$0xff]  }
  0x91   : > { %911 = vmatpush1.bf16.msra.mxu1 %v1783_v24  ;;  %869 = vmatprep.subr.bf16.mxu0 %v1784_v25  ;;  %v1847_v4 = vld [vmem:[%s2351_s22 + $0x10] ss:$24 sps:$4 sm:$0xff]   ;;  %v1850_v6 = vld [vmem:[%s2351_s22 + $0x40] ss:$24 sps:$4 sm:$0xff]   ;;  %v1855_v7 = vld [vmem:[%s2351_s22 + $0x74] ss:$24 sps:$4 sm:$0xff]  }
  0x92   : > { %912 = vmatprep.subr.bf16.mxu1 %v1786_v26  ;;  %v1853_v8 = vld [vmem:[%s2351_s22 + $0x70] ss:$24 sps:$4 sm:$0xff]   ;;  %v1858_v9 = vld [vmem:[%s2351_s22 + $0xa4] ss:$24 sps:$4 sm:$0xff]   ;;  %v1856_v10 = vld [vmem:[%s2351_s22 + $0xa0] ss:$24 sps:$4 sm:$0xff]  }
  0x93   : > { %v1861_v11 = vld [vmem:[%s2351_s22 + $0xd4] ss:$24 sps:$4 sm:$0xff]   ;;  %v1859_v12 = vld [vmem:[%s2351_s22 + $0xd0] ss:$24 sps:$4 sm:$0xff]   ;;  %v1864_v13 = vld [vmem:[%s2351_s22 + $0x104] ss:$24 sps:$4 sm:$0xff]  }
  0x94   : > { %870 = vmatpush1.bf16.msra.mxu0 %v1788_v27  ;;  %v1862_v14 = vld [vmem:[%s2351_s22 + $0x100] ss:$24 sps:$4 sm:$0xff]   ;;  %v1867_v15 = vld [vmem:[%s2351_s22 + $0x134] ss:$24 sps:$4 sm:$0xff]   ;;  %v1865_v16 = vld [vmem:[%s2351_s22 + $0x130] ss:$24 sps:$4 sm:$0xff]  }
  0x95   : > { %913 = vmatpush1.bf16.msra.mxu1 %v1789_v28  ;;  %871 = vmatprep.subr.bf16.mxu0 %v1790_v29  ;;  %v1870_v17 = vld [vmem:[%s2351_s22 + $0x164] ss:$24 sps:$4 sm:$0xff]   ;;  %v1868_v18 = vld [vmem:[%s2351_s22 + $0x160] ss:$24 sps:$4 sm:$0xff]   ;;  %v1873_v19 = vld [vmem:[%s2351_s22 + $0x194] ss:$24 sps:$4 sm:$0xff]  }
  0x96   : > { %914 = vmatprep.subr.bf16.mxu1 %v1792_v30  ;;  %v1871_v20 = vld [vmem:[%s2351_s22 + $0x190] ss:$24 sps:$4 sm:$0xff]   ;;  %v1876_v21 = vld [vmem:[%s2351_s22 + $0x1c4] ss:$24 sps:$4 sm:$0xff]   ;;  %v1874_v22 = vld [vmem:[%s2351_s22 + $0x1c0] ss:$24 sps:$4 sm:$0xff]  }
  0x97   : > { %v1879_v23 = vld [vmem:[%s2351_s22 + $0x1f4] ss:$24 sps:$4 sm:$0xff]   ;;  %v1877_v24 = vld [vmem:[%s2351_s22 + $0x1f0] ss:$24 sps:$4 sm:$0xff]   ;;  %v1882_v25 = vld [vmem:[%s2351_s22 + $0x224] ss:$24 sps:$4 sm:$0xff]  }
  0x98   : > { %872 = vmatpush1.bf16.msra.mxu0 %v1794_v31  ;;  %v1880_v26 = vld [vmem:[%s2351_s22 + $0x220] ss:$24 sps:$4 sm:$0xff]   ;;  %v1885_v27 = vld [vmem:[%s2351_s22 + $0x254] ss:$24 sps:$4 sm:$0xff]   ;;  %v1883_v28 = vld [vmem:[%s2351_s22 + $0x250] ss:$24 sps:$4 sm:$0xff]  }
  0x99   : > { %915 = vmatpush1.bf16.msra.mxu1 %v1795_v32  ;;  %873 = vmatprep.subr.bf16.mxu0 %v1796_v33  ;;  %v1888_v29 = vld [vmem:[%s2351_s22 + $0x284] ss:$24 sps:$4 sm:$0xff]   ;;  %v1886_v30 = vld [vmem:[%s2351_s22 + $0x280] ss:$24 sps:$4 sm:$0xff]   ;;  %v1891_v31 = vld [vmem:[%s2351_s22 + $0x2b4] ss:$24 sps:$4 sm:$0xff]  }
  0x9a   : > { %916 = vmatprep.subr.bf16.mxu1 %v1798_v34  ;;  %v1889_v32 = vld [vmem:[%s2351_s22 + $0x2b0] ss:$24 sps:$4 sm:$0xff]   ;;  %v1894_v33 = vld [vmem:[%s2351_s22 + $0x2e4] ss:$24 sps:$4 sm:$0xff]   ;;  %v1892_v34 = vld [vmem:[%s2351_s22 + $0x2e0] ss:$24 sps:$4 sm:$0xff]  }
  0x9b   : > { %s1391_s6 = sshll.u32 %s2151_s15, 4  ;;  %s1392_s6 = int_to_ptr.vmem [resolvable:$true] %s1391_s6 }
  0x9c   : > { %874 = vmatpush1.bf16.msra.mxu0 %v1800_v35  ;;  %v1897_v35 = vld [vmem:[%s2357_s7 + $0x4] ss:$8 sps:$4 sm:$0xff]   ;;  %s2055_s19 = scalar_lea.vmem %s1392_s6, 512  ;;  %p2062_p6 = scmp.lt.s32.totalorder %s1392_s6, %s1392_s6 }
  0x9d   : > { %917 = vmatpush1.bf16.msra.mxu1 %v1801_v36  ;;  %875 = vmatprep.subr.bf16.mxu0 %v1802_v37  ;;  %v1895_v36 = vld [vmem:[%s2357_s7] ss:$8 sps:$4 sm:$0xff]   ;;  %v1900_v37 = vld [vmem:[%s2357_s7 + $0x14] ss:$8 sps:$4 sm:$0xff]   ;;  %p2056_p0 = scmp.ne.s32.totalorder %s1392_s6, %s2055_s19  ;;  %p2063_p13 = scmp.lt.s32.totalorder %s2055_s19, %s2055_s19 }
  0x9e   : > { %918 = vmatprep.subr.bf16.mxu1 %v1804_v38  ;;  %v1898_v38 = vld [vmem:[%s2357_s7 + $0x10] ss:$8 sps:$4 sm:$0xff]  }
  0x9f   : > { %p2057_p1 = pnand %p2056_p0, %p1687_p10  ;;  %p2064_p2 = por %p2063_p13, %p2062_p6 }
  0xa0   : > { %876 = vmatpush1.bf16.msra.mxu0 %v1806_v39  ;;  %v1903_v39 = vld [vmem:[%s2357_s7 + $0x24] ss:$8 sps:$4 sm:$0xff]  }
  0xa1   : > { %919 = vmatpush1.bf16.msra.mxu1 %v1807_v40  ;;  %877 = vmatprep.subr.bf16.mxu0 %v1808_v41  ;;  %v1901_v40 = vld [vmem:[%s2357_s7 + $0x20] ss:$8 sps:$4 sm:$0xff]   ;;  %v1906_v41 = vld [vmem:[%s2357_s7 + $0x34] ss:$8 sps:$4 sm:$0xff]   ;;  %p2058_p4 = pneg %p2057_p1 }
  0xa2   : > { %920 = vmatprep.subr.bf16.mxu1 %v1810_v42  ;;  %v1904_v42 = vld [vmem:[%s2357_s7 + $0x30] ss:$8 sps:$4 sm:$0xff]  }
  0xa3   : > { %p2065_p7 = pnand %p2064_p2, %p2058_p4 }
  0xa4   : > { %878 = vmatpush1.bf16.msra.mxu0 %v1812_v43  ;;  %v1909_v43 = vld [vmem:[%s2357_s7 + $0x44] ss:$8 sps:$4 sm:$0xff]  }
  0xa5   : > { %921 = vmatpush1.bf16.msra.mxu1 %v1813_v44  ;;  %879 = vmatprep.subr.bf16.mxu0 %v1814_v45  ;;  %v1907_v44 = vld [vmem:[%s2357_s7 + $0x40] ss:$8 sps:$4 sm:$0xff]   ;;  %v1912_v45 = vld [vmem:[%s2357_s7 + $0x54] ss:$8 sps:$4 sm:$0xff]  }
  0xa6   : > { %922 = vmatprep.subr.bf16.mxu1 %v1816_v46  ;;  %v1910_v46 = vld [vmem:[%s2357_s7 + $0x50] ss:$8 sps:$4 sm:$0xff]  }
  0xa8   : > { %880 = vmatpush1.bf16.msra.mxu0 %v1818_v47  ;;  %v1915_v47 = vld [vmem:[%s2357_s7 + $0x64] ss:$8 sps:$4 sm:$0xff]  }
  0xa9   : > { %923 = vmatpush1.bf16.msra.mxu1 %v1819_v48  ;;  %881 = vmatprep.subr.bf16.mxu0 %v1820_v50  ;;  %v1913_v48 = vld [vmem:[%s2357_s7 + $0x60] ss:$8 sps:$4 sm:$0xff]   ;;  %v1916_v50 = vld [vmem:[%s2357_s7 + $0x70] ss:$8 sps:$4 sm:$0xff]  }
  0xaa   : > { %924 = vmatprep.subr.bf16.mxu1 %v1822_v51  ;;  %v1921_v51 = vld [vmem:[%s2357_s7 + $0x84] ss:$8 sps:$4 sm:$0xff]  }
  0xac   : > { %882 = vmatpush1.bf16.msra.mxu0 %v1824_v52  ;;  %v1919_v52 = vld [vmem:[%s2357_s7 + $0x80] ss:$8 sps:$4 sm:$0xff]  }
  0xad   : > { %925 = vmatpush1.bf16.msra.mxu1 %v1825_v53  ;;  %883 = vmatprep.subr.bf16.mxu0 %v1826_v54  ;;  %v1924_v53 = vld [vmem:[%s2357_s7 + $0x94] ss:$8 sps:$4 sm:$0xff]   ;;  %v1922_v54 = vld [vmem:[%s2357_s7 + $0x90] ss:$8 sps:$4 sm:$0xff]  }
  0xae   : > { %926 = vmatprep.subr.bf16.mxu1 %v1828_v55  ;;  %v1927_v55 = vld [vmem:[%s2357_s7 + $0xa4] ss:$8 sps:$4 sm:$0xff]  }
  0xb0   : > { %884 = vmatpush1.bf16.msra.mxu0 %v1830_v56  ;;  %v1925_v56 = vld [vmem:[%s2357_s7 + $0xa0] ss:$8 sps:$4 sm:$0xff]  }
  0xb1   : > { %927 = vmatpush1.bf16.msra.mxu1 %v1831_v57  ;;  %885 = vmatprep.subr.bf16.mxu0 %v1832_v58  ;;  %v1930_v57 = vld [vmem:[%s2357_s7 + $0xb4] ss:$8 sps:$4 sm:$0xff]   ;;  %v1928_v58 = vld [vmem:[%s2357_s7 + $0xb0] ss:$8 sps:$4 sm:$0xff]  }
  0xb2   : > { %928 = vmatprep.subr.bf16.mxu1 %v1834_v59  ;;  %v1933_v59 = vld [vmem:[%s2357_s7 + $0xc4] ss:$8 sps:$4 sm:$0xff]  }
  0xb4   : > { %886 = vmatpush1.bf16.msra.mxu0 %v1836_v60  ;;  %v1931_v60 = vld [vmem:[%s2357_s7 + $0xc0] ss:$8 sps:$4 sm:$0xff]  }
  0xb5   : > { %929 = vmatpush1.bf16.msra.mxu1 %v1837_v61  ;;  %887 = vmatprep.subr.bf16.mxu0 %v1838_v62  ;;  %v1936_v61 = vld [vmem:[%s2357_s7 + $0xd4] ss:$8 sps:$4 sm:$0xff]   ;;  %v1934_v62 = vld [vmem:[%s2357_s7 + $0xd0] ss:$8 sps:$4 sm:$0xff]  }
  0xb6   : > { %930 = vmatprep.subr.bf16.mxu1 %v1840_v63  ;;  %v1939_v63 = vld [vmem:[%s2357_s7 + $0xe4] ss:$8 sps:$4 sm:$0xff]  }
  0xb8   : > { %888 = vmatpush1.bf16.msra.mxu0 %v1842_v0  ;;  %v1937_v0 = vld [vmem:[%s2357_s7 + $0xe0] ss:$8 sps:$4 sm:$0xff]  }
  0xb9   : > { %931 = vmatpush1.bf16.msra.mxu1 %v1843_v1  ;;  %943 = vmatprep.subr.bf16.mxu0 %v1849_v2  ;;  %v1942_v1 = vld [vmem:[%s2357_s7 + $0xf4] ss:$8 sps:$4 sm:$0xff]   ;;  %v1940_v2 = vld [vmem:[%s2357_s7 + $0xf0] ss:$8 sps:$4 sm:$0xff]  }
  0xba   : > { %1287 = vmatprep.subr.bf16.mxu1 %v1897_v35  ;;  %v1960_v35 = vld [vmem:[%s2357_s7 + $0x154] ss:$8 sps:$4 sm:$0xff]  }
  0xbb   : > { %890 = vmatmul.mubr.bf16.vlgmr.msra.gmra.mrb[0].mxu0 %v2425_v3 }
  0xbc   : > { %933 = vmatmul.mubr.bf16.vlgmr.msra.gmra.mrb[0].mxu1 %v2425_v3  ;;  %944 = vmatpush1.bf16.msra.mxu0 %v1847_v4 }
  0xbd   : > { %975 = vmatprep.mubr.bf16.mxu0 %v1844_v49  ;;  %945 = vmatprep.subr.bf16.mxu0 %v1852_v5  ;;  %v1918_v49 = vld [vmem:[%s2357_s7 + $0x74] ss:$8 sps:$4 sm:$0xff]  }
  0xbe   : > { %1288 = vmatpush1.bf16.msra.mxu1 %v1895_v36  ;;  %v1958_v36 = vld [vmem:[%s2357_s7 + $0x150] ss:$8 sps:$4 sm:$0xff]  }
  0xbf   : > { %1289 = vmatprep.subr.bf16.mxu1 %v1900_v37  ;;  %v1963_v37 = vld [vmem:[%s2357_s7 + $0x164] ss:$8 sps:$4 sm:$0xff]  }
  0xc0   : > { %946 = vmatpush1.bf16.msra.mxu0 %v1850_v6 }
  0xc1   : > { %947 = vmatprep.subr.bf16.mxu0 %v1855_v7 }
  0xc2   : > { %1290 = vmatpush1.bf16.msra.mxu1 %v1898_v38  ;;  %v1961_v38 = vld [vmem:[%s2357_s7 + $0x160] ss:$8 sps:$4 sm:$0xff]  }
  0xc3   : > { %1291 = vmatprep.subr.bf16.mxu1 %v1903_v39  ;;  %v1966_v39 = vld [vmem:[%s2357_s7 + $0x174] ss:$8 sps:$4 sm:$0xff]  }
  0xc4   : > { %948 = vmatpush1.bf16.msra.mxu0 %v1853_v8 }
  0xc5   : > { %949 = vmatprep.subr.bf16.mxu0 %v1858_v9 }
  0xc6   : > { %1292 = vmatpush1.bf16.msra.mxu1 %v1901_v40  ;;  %v1964_v40 = vld [vmem:[%s2357_s7 + $0x170] ss:$8 sps:$4 sm:$0xff]  }
  0xc7   : > { %1293 = vmatprep.subr.bf16.mxu1 %v1906_v41  ;;  %v995_v41 = vld [vmem:[#allocation8] sm:$0xff] }
  0xc8   : > { %950 = vmatpush1.bf16.msra.mxu0 %v1856_v10 }
  0xc9   : > { %951 = vmatprep.subr.bf16.mxu0 %v1861_v11 }
  0xca   : > { %1294 = vmatpush1.bf16.msra.mxu1 %v1904_v42  ;;  %v996_v42 = vld [vmem:[#allocation8 + $0x8] sm:$0xff] }
  0xcb   : > { %1295 = vmatprep.subr.bf16.mxu1 %v1909_v43 }
  0xcc   : > { %952 = vmatpush1.bf16.msra.mxu0 %v1859_v12 }
  0xcd   : > { %953 = vmatprep.subr.bf16.mxu0 %v1864_v13 }
  0xce   : > { %1296 = vmatpush1.bf16.msra.mxu1 %v1907_v44  ;;  %v997_v44 = vld [vmem:[#allocation8 + $0x10] sm:$0xff] }
  0xcf   : > { %1297 = vmatprep.subr.bf16.mxu1 %v1912_v45 }
  0xd0   : > { %954 = vmatpush1.bf16.msra.mxu0 %v1862_v14 }
  0xd1   : > { %955 = vmatprep.subr.bf16.mxu0 %v1867_v15 }
  0xd2   : > { %1298 = vmatpush1.bf16.msra.mxu1 %v1910_v46 }
  0xd3   : > { %1299 = vmatprep.subr.bf16.mxu1 %v1915_v47  ;;  %v998_v47 = vld [vmem:[#allocation8 + $0x18] sm:$0xff] }
  0xd4   : > { %956 = vmatpush1.bf16.msra.mxu0 %v1865_v16 }
  0xd5   : > { %957 = vmatprep.subr.bf16.mxu0 %v1870_v17 }
  0xd6   : > { %1300 = vmatpush1.bf16.msra.mxu1 %v1913_v48 }
  0xd7   : > { %1301 = vmatprep.subr.bf16.mxu1 %v1918_v49 }
  0xd8   : > { %958 = vmatpush1.bf16.msra.mxu0 %v1868_v18 }
  0xd9   : > { %959 = vmatprep.subr.bf16.mxu0 %v1873_v19 }
  0xda   : > { %1302 = vmatpush1.bf16.msra.mxu1 %v1916_v50 }
  0xdb   : > { %1303 = vmatprep.subr.bf16.mxu1 %v1921_v51 }
  0xdc   : > { %960 = vmatpush1.bf16.msra.mxu0 %v1871_v20 }
  0xdd   : > { %961 = vmatprep.subr.bf16.mxu0 %v1876_v21 }
  0xde   : > { %1304 = vmatpush1.bf16.msra.mxu1 %v1919_v52 }
  0xdf   : > { %1305 = vmatprep.subr.bf16.mxu1 %v1924_v53 }
  0xe0   : > { %962 = vmatpush1.bf16.msra.mxu0 %v1874_v22 }
  0xe1   : > { %963 = vmatprep.subr.bf16.mxu0 %v1879_v23 }
  0xe2   : > { %1306 = vmatpush1.bf16.msra.mxu1 %v1922_v54 }
  0xe3   : > { %1307 = vmatprep.subr.bf16.mxu1 %v1927_v55 }
  0xe4   : > { %964 = vmatpush1.bf16.msra.mxu0 %v1877_v24  ;;  %v1943_v24 = vld [vmem:[%s2357_s7 + $0x100] ss:$8 sps:$4 sm:$0xff]  }
  0xe5   : > { %965 = vmatprep.subr.bf16.mxu0 %v1882_v25 }
  0xe6   : > { %1308 = vmatpush1.bf16.msra.mxu1 %v1925_v56 }
  0xe7   : > { %1309 = vmatprep.subr.bf16.mxu1 %v1930_v57 }
  0xe8   : > { %966 = vmatpush1.bf16.msra.mxu0 %v1880_v26  ;;  %v1948_v26 = vld [vmem:[%s2357_s7 + $0x114] ss:$8 sps:$4 sm:$0xff]  }
  0xe9   : > { %967 = vmatprep.subr.bf16.mxu0 %v1885_v27  ;;  %v1946_v27 = vld [vmem:[%s2357_s7 + $0x110] ss:$8 sps:$4 sm:$0xff]  }
  0xea   : > { %1310 = vmatpush1.bf16.msra.mxu1 %v1928_v58 }
  0xeb   : > { %1311 = vmatprep.subr.bf16.mxu1 %v1933_v59 }
  0xec   : > { %968 = vmatpush1.bf16.msra.mxu0 %v1883_v28  ;;  %v2150_v28 = vmov 0  }
  0xed   : > { %969 = vmatprep.subr.bf16.mxu0 %v1888_v29  ;;  %v1951_v29 = vld [vmem:[%s2357_s7 + $0x124] ss:$8 sps:$4 sm:$0xff]  }
  0xee   : > { %1312 = vmatpush1.bf16.msra.mxu1 %v1931_v60 }
  0xef   : > { %1313 = vmatprep.subr.bf16.mxu1 %v1936_v61 }
  0xf0   : > { %970 = vmatpush1.bf16.msra.mxu0 %v1886_v30  ;;  %v1949_v30 = vld [vmem:[%s2357_s7 + $0x120] ss:$8 sps:$4 sm:$0xff]  }
  0xf1   : > { %971 = vmatprep.subr.bf16.mxu0 %v1891_v31  ;;  %v1954_v31 = vld [vmem:[%s2357_s7 + $0x134] ss:$8 sps:$4 sm:$0xff]  }
  0xf2   : > { %1314 = vmatpush1.bf16.msra.mxu1 %v1934_v62 }
  0xf3   : > { %1315 = vmatprep.subr.bf16.mxu1 %v1939_v63 }
  0xf4   : > { %972 = vmatpush1.bf16.msra.mxu0 %v1889_v32  ;;  %v1952_v32 = vld [vmem:[%s2357_s7 + $0x130] ss:$8 sps:$4 sm:$0xff]  }
  0xf5   : > { %973 = vmatprep.subr.bf16.mxu0 %v1894_v33  ;;  %v1957_v33 = vld [vmem:[%s2357_s7 + $0x144] ss:$8 sps:$4 sm:$0xff]  }
  0xf6   : > { %1316 = vmatpush1.bf16.msra.mxu1 %v1937_v0 }
  0xf7   : > { %1317 = vmatprep.subr.bf16.mxu1 %v1942_v1 }
  0xf8   : > { %974 = vmatpush1.bf16.msra.mxu0 %v1892_v34  ;;  %v1955_v34 = vld [vmem:[%s2357_s7 + $0x140] ss:$8 sps:$4 sm:$0xff]  }
  0xfa   : > { %1318 = vmatpush1.bf16.msra.mxu1 %v1940_v2 }
  0xfb   : > { %976 = vmatmul.mubr.bf16.vlgmr.msra.gmra.mrb[4].mxu0 %v2425_v3  ;;  %v1945_v3 = vld [vmem:[%s2357_s7 + $0x104] ss:$8 sps:$4 sm:$0xff]  }
  0xfc   : > { %1330 = vmatprep.subr.bf16.mxu1 %v1945_v3 }
 0x18e   : > { %v891_v4 = vpop.f32.mrb[0].mxu0 }
 0x18f   : > { %v934_v5 = vpop.f32.mrb[0].mxu1  ;;  %v893_v6 = vpop.f32.mrb[1].mxu0 }
 0x190   : > { %v936_v7 = vpop.f32.mrb[1].mxu1  ;;  %v895_v9 = vpop.f32.mrb[2].mxu0 }
 0x191   : > { %v986_v8 = vmul.f32 %v936_v7, %v891_v4  ;;  %v938_v10 = vpop.f32.mrb[2].mxu1  ;;  %v897_v11 = vpop.f32.mrb[3].mxu0 }
 0x192   : > { %v940_v12 = vpop.f32.mrb[3].mxu1 }
 0x193   : > { %v989_v13 = vmul.f32 %v940_v12, %v895_v9 }
 0x195   : > { %v992_v14 = vpack.c.bf16 %v989_v13, %v986_v8 }
 0x1ce   : > { %v977_v15 = vpop.f32.mrb[4].mxu0 }
 0x1cf   : > { %v987_v16 = vmul.f32 %v977_v15, %v893_v6  ;;  %v979_v17 = vpop.f32.mrb[5].mxu0 }
 0x1d0   : > { %v988_v18 = vmul.f32 %v979_v17, %v934_v5  ;;  %v981_v19 = vpop.f32.mrb[6].mxu0 }
 0x1d1   : > { %v990_v20 = vmul.f32 %v981_v19, %v897_v11  ;;  %v983_v21 = vpop.f32.mrb[7].mxu0 }
 0x1d2   : > { %v991_v22 = vmul.f32 %v983_v21, %v938_v10 }
 0x1d3   : > { %v993_v23 = vpack.c.bf16 %v990_v20, %v987_v16 }
 0x1d4   : > { %v994_v25 = vpack.c.bf16 %v991_v22, %v988_v18 }
 0x1d5   : > { %1319 = vmatprep.mubr.bf16.mxu1 %v993_v23 }
 0x1d6   : > { %1320 = vmatmul.mubr.bf16.vlgmr.msra.gmra.mrb[4].mxu1 %v992_v14 }
 0x1d7   : > { %1331 = vmatpush1.bf16.msra.mxu1 %v1943_v24  ;;  %1362 = vmatprep.mubr.bf16.mxu1 %v2150_v28 }
 0x1d8   : > { %1332 = vmatprep.subr.bf16.mxu1 %v1948_v26 }
 0x1db   : > { %1333 = vmatpush1.bf16.msra.mxu1 %v1946_v27 }
 0x1dc   : > { %1334 = vmatprep.subr.bf16.mxu1 %v1951_v29 }
 0x1df   : > { %1335 = vmatpush1.bf16.msra.mxu1 %v1949_v30 }
 0x1e0   : > { %1336 = vmatprep.subr.bf16.mxu1 %v1954_v31 }
 0x1e3   : > { %1337 = vmatpush1.bf16.msra.mxu1 %v1952_v32 }
 0x1e4   : > { %1338 = vmatprep.subr.bf16.mxu1 %v1957_v33 }
 0x1e7   : > { %1339 = vmatpush1.bf16.msra.mxu1 %v1955_v34 }
 0x1e8   : > { %1340 = vmatprep.subr.bf16.mxu1 %v1960_v35 }
 0x1eb   : > { %1341 = vmatpush1.bf16.msra.mxu1 %v1958_v36 }
 0x1ec   : > { %1342 = vmatprep.subr.bf16.mxu1 %v1963_v37 }
 0x1ef   : > { %1343 = vmatpush1.bf16.msra.mxu1 %v1961_v38 }
 0x1f0   : > { %1344 = vmatprep.subr.bf16.mxu1 %v1966_v39 }
 0x1f3   : > { %1345 = vmatpush1.bf16.msra.mxu1 %v1964_v40 }
 0x1f6   : > { %1363 = vmatmul.mubr.bf16.vlgmr.msra.gmra.mrb[4].mxu1 %v994_v25 }
 0x2c9   : > { %v1364_v43 = vpop.f32.mrb[4].mxu1 }
 0x2ca   : > { %v1373_v45 = vadd.f32 %v1364_v43, %v995_v41  ;;  %v1366_v46 = vpop.f32.mrb[5].mxu1 }
 0x2cb   : > { %v1374_v48 = vadd.f32 %v1366_v46, %v996_v42  ;;  %v1368_v49 = vpop.f32.mrb[6].mxu1 }
 0x2cc   : > { %1377 = vst [vmem:[#allocation8] sm:$0xff] %v1373_v45  ;;  %v1375_v50 = vadd.f32 %v1368_v49, %v997_v44  ;;  %v1370_v51 = vpop.f32.mrb[7].mxu1 }
 0x2cd   : > { %1378 = vst [vmem:[#allocation8 + $0x8] sm:$0xff] %v1374_v48  ;;  %v1376_v52 = vadd.f32 %v1370_v51, %v998_v47 }
 0x2ce   : > { %1379 = vst [vmem:[#allocation8 + $0x10] sm:$0xff] %v1375_v50 }
 0x2cf   : > { %1380 = vst [vmem:[#allocation8 + $0x18] sm:$0xff] %v1376_v52 }
 0x2d0   : > { %2068 = shalt.err (!%p2065_p7)
}
 0x2d1   : > { %s2069_s23 = scalar_lea.hbm %s2553_s3, 512 }
 0x2d2   : > { %p2070_p9 = scmp.ne.s32.totalorder %s2553_s3, %s2069_s23  ;;  %p2075_p11 = scmp.lt.u32.totalorder %s2069_s23, %s2553_s3 }
 0x2d4   : > { %p2071_p3 = pnand %p2070_p9, %p1687_p10 }
 0x2d6   : > { %p2072_p5 = pneg %p2071_p3 }
 0x2d8   : > { %p2077_p12 = pnand %p2075_p11, %p2072_p5 }
 0x2da   : > { %2080 = shalt.err (!%p2077_p12)
}
 0x2db   : > { %s2152_s12 = smov 256   ;;  %s2153_s11 = smov 16  }
 0x2dc   : > { %1670 = dma.vmem_to_hbm [thread:$0]  (%p1687_p10), %s1392_s6, 512, %s2553_s3, [#allocation4], %s2152_s12, %s2152_s12, %s2153_s11  }
 0x2dd   : > { %2114 = dma.done.wait (%p1687_p10), [#allocation4], 512  }
 0x2de   : > { %2116 = vsyncadd (%p1687_p10), [#allocation4], 4294966784 }
 0x2df PF: > { %s18_s17 = sadd.s32 1, %s2139_s17   ;;  %s2571_s12 = smov %s2123_s13 }
 0x2e0   : > { %p15_p8 = scmp.ge.s32.totalorder %s18_s17, 4   ;;  %s2572_s13 = smov %s2127_s14 }
 0x2e1   : > { %s2573_s14 = smov %s2218_s24  ;;  %s2574_s15 = smov %s2135_s16 }
 0x2e2   : > { %s2575_s16 = smov %s2577_s18  ;;  %17 = sbr.rel (!%p15_p8) target bundleno = 6 (0x6), region = 91 }
 0x2e9   :  { %1407 = vsyncpa [#allocation3], 1 }
 0x2ea   :  { %1409 = vsyncpa [#allocation3 + $0x1], 1 }
 0x2eb   :  { %1410 = vsyncpa [#allocation6], 1 }
 0x2ec   :  { %1412 = vsyncpa [#allocation6 + $0x1], 1 }
 0x2ed   :  { %1413 = vsyncpa [#allocation4], 1 }
 0x2ee   :  { %1415 = vsyncpa [#allocation4 + $0x1], 1 }

</bundles_post_ra>
